<compile_context>
chip_gen: v7x
topology: tpu7x:2x2x1
jax: 0.10.0
libtpu: 0.0.40
codegen_flags: <defaults>
</compile_context>

<pallas_src>
import jax
import jax.numpy as jnp
from jax.experimental import pallas as pl
from jax.experimental.pallas import tpu as pltpu

num_UAV = 2
N_actions = 4 * num_UAV                                       # 8
location_DEV = 2
location_UAV = 2
num_DEV = 40
N_states = location_UAV * num_UAV + location_DEV * num_DEV    # 84
HIDDEN = 128
N_OUT_PAD = 128           # lane-dense padded output width (N_actions=8 -> 128)
MAX_TILE_B = 1024         # cap per-tile rows for very large replay batches


def _round_up(n, m):
    return ((n + m - 1) // m) * m


def _net_kernel(x_ref, w1_ref, b1_ref, w2_ref, b2_ref, o_ref):
    # x_ref:  (TB, N_states)            [compute dtype: f32 or bf16]
    # w1_ref: (N_states, HIDDEN)        [compute dtype]
    # b1_ref: (1, HIDDEN)               [f32]
    # w2_ref: (HIDDEN, N_OUT_PAD)       [compute dtype]
    # b2_ref: (1, N_OUT_PAD)            [f32]
    # o_ref:  (TB, N_OUT_PAD)
    h = jnp.dot(x_ref[...], w1_ref[...], preferred_element_type=jnp.float32)
    h = jnp.maximum(h + b1_ref[...], 0.0)                 # bias + ReLU in f32
    y = jnp.dot(h.astype(w2_ref.dtype), w2_ref[...],
                preferred_element_type=jnp.float32)
    o_ref[...] = (y + b2_ref[...]).astype(o_ref.dtype)


def prepare_params(w1, b1, w2, b2):
    """One-time param prep: lane-pad layer-2 params to 128 outputs, f32 biases.

    Call this once (at init / after each optimizer step), not per forward.
    """
    w1 = jnp.asarray(w1)                                   # (N_states, HIDDEN)
    b1 = jnp.asarray(b1, dtype=jnp.float32).reshape(1, HIDDEN)
    w2 = jnp.asarray(w2)                                   # (HIDDEN, N_actions)
    b2 = jnp.asarray(b2, dtype=jnp.float32).reshape(1, N_actions)
    w2p = jnp.zeros((HIDDEN, N_OUT_PAD), w2.dtype).at[:, :N_actions].set(w2)
    b2p = jnp.zeros((1, N_OUT_PAD), jnp.float32).at[:, :N_actions].set(b2)
    return w1, b1, w2p, b2p


def net_forward(x, params, *, num_tiles=None, out_dtype=jnp.float32):
    """y = relu(x @ w1 + b1) @ w2 + b2 as a batch-tiled Pallas call.

    `params` must come from `prepare_params`.  Weights stay VMEM-resident
    across all batch tiles (constant index_maps); output is computed 128 lanes
    wide (unmasked vst) and sliced back to N_actions here.

    num_tiles: None -> single fat tile (best on v5e/v6e, 1 TensorCore);
               2    -> one tile per TensorCore on v7x megacore.
    """
    w1, b1, w2p, b2p = params
    B = x.shape[0]

    # Cast input once in the wrapper (no-op for f32; halves x DMA for bf16).
    x = x.astype(w1.dtype)

    # Right-size the batch tile.
    if num_tiles is not None:
        tile_b = max(8, _round_up(pl.cdiv(B, num_tiles), 8))
    else:
        tile_b = min(max(8, _round_up(B, 8)), MAX_TILE_B)
    n_tiles = pl.cdiv(B, tile_b)
    b_pad = n_tiles * tile_b
    if b_pad != B:
        # Only hit when B is not a multiple of 8 (or of the chosen tile).
        x = jnp.pad(x, ((0, b_pad - B), (0, 0)))

    # Per-tile VMEM footprint (x + out, double-buffered) stays < ~2 MiB at the
    # 1024-row cap -> safe on every generation incl. v7x's 64 MiB VMEM; no
    # vmem_limit_bytes override needed unless MAX_TILE_B is raised a lot.
    out = pl.pallas_call(
        _net_kernel,
        out_shape=jax.ShapeDtypeStruct((b_pad, N_OUT_PAD), out_dtype),
        grid=(n_tiles,),
        in_specs=[
            pl.BlockSpec((tile_b, N_states), lambda i: (i, 0)),
            # Params: same block every step -> DMA'd from HBM once, VMEM-resident.
            pl.BlockSpec((N_states, HIDDEN), lambda i: (0, 0)),
            pl.BlockSpec((1, HIDDEN), lambda i: (0, 0)),
            pl.BlockSpec((HIDDEN, N_OUT_PAD), lambda i: (0, 0)),
            pl.BlockSpec((1, N_OUT_PAD), lambda i: (0, 0)),
        ],
        out_specs=pl.BlockSpec((tile_b, N_OUT_PAD), lambda i: (i, 0)),
        compiler_params=pltpu.CompilerParams(
            # Batch tiles are independent -> megacore sharding on v7x.
            dimension_semantics=("parallel",)),
    )(x, w1, b1, w2p, b2p)

    return out[:B, :N_actions]


def init_params(key, param_dtype=jnp.float32):
    k1, k2, k3, k4 = jax.random.split(key, 4)
    # fc1.weight.data.normal_(0, 0.1)  -> stored transposed as (in, out)
    w1 = (0.1 * jax.random.normal(k1, (N_states, HIDDEN))).astype(param_dtype)
    # PyTorch Linear bias default: U(-1/sqrt(fan_in), 1/sqrt(fan_in)); keep f32.
    bound1 = 1.0 / jnp.sqrt(jnp.float32(N_states))
    b1 = jax.random.uniform(k2, (1, HIDDEN),
                            minval=-bound1, maxval=bound1).astype(jnp.float32)
    # out.weight.data.normal_(0, 0.1)
    w2 = (0.1 * jax.random.normal(k3, (HIDDEN, N_actions))).astype(param_dtype)
    bound2 = 1.0 / jnp.sqrt(jnp.float32(HIDDEN))
    b2 = jax.random.uniform(k4, (1, N_actions),
                            minval=-bound2, maxval=bound2).astype(jnp.float32)
    return w1, b1, w2, b2


if __name__ == "__main__":
    key = jax.random.PRNGKey(0)
    kx, kp = jax.random.split(key)

    w1, b1, w2, b2 = init_params(kp)
    params = prepare_params(w1, b1, w2, b2)          # one-time, outside forward

    # 1) Small batch (RL action-selection path): 8-row tile, no jnp.pad.
    B_small = 8
    xs = jax.random.normal(kx, (B_small, N_states), dtype=jnp.float32)
    out_s = jax.block_until_ready(net_forward(xs, params))
    ref_s = jnp.maximum(xs @ w1 + b1, 0.0) @ w2 + b2
    assert out_s.shape == (B_small, N_actions)
    assert jnp.allclose(out_s, ref_s, atol=1e-5, rtol=1e-5)

    # 2) DQN replay batch: single fat 256-row tile (fills the 256-row MXU).
    B = 256
    x = jax.random.normal(jax.random.fold_in(kx, 1), (B, N_states),
                          dtype=jnp.float32)
    out = jax.block_until_ready(net_forward(x, params))
    ref = jnp.maximum(x @ w1 + b1, 0.0) @ w2 + b2
    assert out.shape == (B, N_actions)
    assert jnp.allclose(out, ref, atol=1e-5, rtol=1e-5)

    # 3) Two-tile split (v7x megacore layout: one 128-row tile per TensorCore).
    out2 = jax.block_until_ready(net_forward(x, params, num_tiles=2))
    assert jnp.allclose(out2, ref, atol=1e-5, rtol=1e-5)

    # 4) bf16 weights + bf16 x + bf16 output: halves both dominant HBM streams.
    #    Reference mirrors the kernel math exactly (bf16 operands, f32 accum /
    #    bias / ReLU) so the tolerance only covers final-output rounding.
    w1b, b1b, w2b, b2b = init_params(kp, param_dtype=jnp.bfloat16)
    params_b = prepare_params(w1b, b1b, w2b, b2b)
    out3 = jax.block_until_ready(
        net_forward(x, params_b, out_dtype=jnp.bfloat16))
    xb = x.astype(jnp.bfloat16)
    h_ref = jnp.maximum(
        jnp.dot(xb, w1b, preferred_element_type=jnp.float32) + b1b, 0.0)
    ref3 = (jnp.dot(h_ref.astype(jnp.bfloat16), w2b,
                    preferred_element_type=jnp.float32) + b2b)
    assert out3.dtype == jnp.bfloat16 and out3.shape == (B, N_actions)
    assert jnp.allclose(out3.astype(jnp.float32), ref3, atol=2e-2, rtol=2e-2)

    print("KERNEL_OK")
</pallas_src>

<mosaic_0001>
module attributes {stable_mosaic.version = 11 : i64} {
  func.func @_net_kernel(%arg0: i32, %arg1: memref<8x84xf32, #tpu.memory_space<vmem>>, %arg2: memref<84x128xf32, #tpu.memory_space<vmem>>, %arg3: memref<1x128xf32, #tpu.memory_space<vmem>>, %arg4: memref<128x128xf32, #tpu.memory_space<vmem>>, %arg5: memref<1x128xf32, #tpu.memory_space<vmem>>, %arg6: memref<8x128xf32, #tpu.memory_space<vmem>>) attributes {dimension_semantics = [#tpu.dimension_semantics<parallel>], iteration_bounds = array<i64: 1>, scalar_prefetch = 0 : i64, scratch_operands = 0 : i64, tpu.core_type = #tpu.core_type<tc>, window_params = [{transform_indices = @transform_0, window_bounds = array<i64: 8, 84>}, {pipeline_mode = #tpu.pipeline_mode<synchronous>, transform_indices = @transform_1, window_bounds = array<i64: 84, 128>}, {pipeline_mode = #tpu.pipeline_mode<synchronous>, transform_indices = @transform_2, window_bounds = array<i64: 1, 128>}, {pipeline_mode = #tpu.pipeline_mode<synchronous>, transform_indices = @transform_3, window_bounds = array<i64: 128, 128>}, {pipeline_mode = #tpu.pipeline_mode<synchronous>, transform_indices = @transform_4, window_bounds = array<i64: 1, 128>}, {transform_indices = @transform_5, window_bounds = array<i64: 8, 128>}]} {
    %c0 = arith.constant 0 : index
    %c0_0 = arith.constant 0 : index
    %0 = vector.load %arg1[%c0, %c0_0] : memref<8x84xf32, #tpu.memory_space<vmem>>, vector<8x84xf32>
    %c0_1 = arith.constant 0 : index
    %c0_2 = arith.constant 0 : index
    %1 = vector.load %arg2[%c0_1, %c0_2] : memref<84x128xf32, #tpu.memory_space<vmem>>, vector<84x128xf32>
    %cst = arith.constant dense<0.000000e+00> : vector<8x128xf32>
    %2 = tpu.matmul %0, %1, %cst {dimension_numbers = #tpu.dot_dimension_numbers<[1], [0], [0], [1], [0, 0, 1, 1], [], []>} : vector<8x84xf32>, vector<84x128xf32>, vector<8x128xf32> -> vector<8x128xf32>
    %c0_3 = arith.constant 0 : index
    %c0_4 = arith.constant 0 : index
    %3 = vector.load %arg3[%c0_3, %c0_4] : memref<1x128xf32, #tpu.memory_space<vmem>>, vector<1x128xf32>
    %4 = vector.broadcast %3 : vector<1x128xf32> to vector<8x128xf32>
    %5 = arith.addf %2, %4 : vector<8x128xf32>
    %cst_5 = arith.constant 0.000000e+00 : f32
    %6 = vector.broadcast %cst_5 : f32 to vector<8x128xf32>
    %7 = arith.maximumf %5, %6 : vector<8x128xf32>
    %c0_6 = arith.constant 0 : index
    %c0_7 = arith.constant 0 : index
    %8 = vector.load %arg4[%c0_6, %c0_7] : memref<128x128xf32, #tpu.memory_space<vmem>>, vector<128x128xf32>
    %cst_8 = arith.constant dense<0.000000e+00> : vector<8x128xf32>
    %9 = tpu.matmul %7, %8, %cst_8 {dimension_numbers = #tpu.dot_dimension_numbers<[1], [0], [0], [1], [0, 0, 1, 1], [], []>} : vector<8x128xf32>, vector<128x128xf32>, vector<8x128xf32> -> vector<8x128xf32>
    %c0_9 = arith.constant 0 : index
    %c0_10 = arith.constant 0 : index
    %10 = vector.load %arg5[%c0_9, %c0_10] : memref<1x128xf32, #tpu.memory_space<vmem>>, vector<1x128xf32>
    %11 = vector.broadcast %10 : vector<1x128xf32> to vector<8x128xf32>
    %12 = arith.addf %9, %11 : vector<8x128xf32>
    %c0_11 = arith.constant 0 : index
    %c0_12 = arith.constant 0 : index
    %13 = vector.load %arg6[%c0_11, %c0_12] : memref<8x128xf32, #tpu.memory_space<vmem>>, vector<8x128xf32>
    tpu.vector_store %arg6[%c0_11, %c0_12], %12 {strides = array<i32>} : memref<8x128xf32, #tpu.memory_space<vmem>>, vector<8x128xf32>,
    return
  }
  func.func @transform_0(%arg0: i32) -> (i32, i32) {
    %c0_i32 = arith.constant 0 : i32
    %c0_i32_0 = arith.constant 0 : i32
    return %arg0, %c0_i32 : i32, i32
  }
  func.func @transform_1(%arg0: i32) -> (i32, i32) {
    %c0_i32 = arith.constant 0 : i32
    %c0_i32_0 = arith.constant 0 : i32
    %c0_i32_1 = arith.constant 0 : i32
    return %c0_i32, %c0_i32_0 : i32, i32
  }
  func.func @transform_2(%arg0: i32) -> (i32, i32) {
    %c0_i32 = arith.constant 0 : i32
    %c0_i32_0 = arith.constant 0 : i32
    %c0_i32_1 = arith.constant 0 : i32
    return %c0_i32, %c0_i32_0 : i32, i32
  }
  func.func @transform_3(%arg0: i32) -> (i32, i32) {
    %c0_i32 = arith.constant 0 : i32
    %c0_i32_0 = arith.constant 0 : i32
    %c0_i32_1 = arith.constant 0 : i32
    return %c0_i32, %c0_i32_0 : i32, i32
  }
  func.func @transform_4(%arg0: i32) -> (i32, i32) {
    %c0_i32 = arith.constant 0 : i32
    %c0_i32_0 = arith.constant 0 : i32
    %c0_i32_1 = arith.constant 0 : i32
    return %c0_i32, %c0_i32_0 : i32, i32
  }
  func.func @transform_5(%arg0: i32) -> (i32, i32) {
    %c0_i32 = arith.constant 0 : i32
    %c0_i32_0 = arith.constant 0 : i32
    return %arg0, %c0_i32 : i32, i32
  }
}

</mosaic_0001>

<bundles_post_ra>
// kernel: tpu_custom_call.1
= control target key start
LH: loop header
LB: loop body
LE: loop exit
PB: predicated region body
PF: predicated region fallthrough
CT: control target
= control target key end

     0   :  { %10 = vsyncpa [#allocation3], 0  ;;  %s615_s0 = inlined_call_operand.hbm [shape: f32[8,84], index: 0, kind: input, shape index: {}]   ;;  %s616_s1 = inlined_call_operand.hbm [shape: f32[84,128], index: 1, kind: input, shape index: {}]   ;;  %s617_s2 = inlined_call_operand.vmem [shape: f32[1,128], index: 2, kind: input, shape index: {}]   ;;  %s618_s3 = inlined_call_operand.hbm [shape: f32[128,128], index: 3, kind: input, shape index: {}]   ;;  %s619_s4 = inlined_call_operand.vmem [shape: f32[1,128], index: 4, kind: input, shape index: {}]   ;;  %s620_s5 = inlined_call_operand.hbm [shape: f32[8,128], index: 5, kind: output, shape index: {}]  }
   0x1   :  { %11 = vsyncpa [#allocation6], 0 }
   0x2   :  { %12 = vsyncpa [#allocation4], 0  ;;  %s503_s18 = smov [#allocation5]   ;;  %s409_s22 = scalar_lea.hbm %s616_s1, 1408 }
   0x3   :  { %s28_s19 = sshll.u32 %s503_s18, 4  ;;  %p410_p0 = scmp.ne.s32.totalorder %s616_s1, %s409_s22  ;;  %s29_s19 = int_to_ptr.vmem [resolvable:$true] %s28_s19 }
   0x4   :  { %p413_p1 = scmp.lt.u32.totalorder %s409_s22, %s616_s1 }
   0x6   :  { %p415_p2 = pnand %p413_p1, %p410_p0 }
   0x8   :  { %418 = shalt.err (!%p415_p2)
}
   0x9   :  { %s419_s27 = scalar_lea.vmem %s29_s19, 1408  ;;  %p424_p4 = scmp.lt.s32.totalorder %s29_s19, %s29_s19 }
   0xa   :  { %p420_p3 = scmp.ne.s32.totalorder %s29_s19, %s419_s27  ;;  %p425_p5 = scmp.lt.s32.totalorder %s419_s27, %s419_s27 }
   0xc   :  { %p426_p6 = por %p425_p5, %p424_p4 }
   0xe   :  { %p427_p7 = pnand %p426_p6, %p420_p3 }
  0x10   :  { %430 = shalt.err (!%p427_p7)
}
  0x11   :  { %s504_s28 = smov 128   ;;  %s505_s29 = smov 8  }
  0x12   :  { %34 = dma.hbm_to_vmem [thread:$0]  %s616_s1, 1408, %s29_s19, [#allocation6], %s504_s28, %s504_s28, %s505_s29  }
  0x13   :  { %s506_s7 = smov [#allocation2]   ;;  %s507_s9 = smov [#allocation7]  }
  0x14   :  { %s19_s8 = sshll.u32 %s506_s7, 4  ;;  %s42_s10 = sshll.u32 %s507_s9, 4  ;;  %s20_s8 = int_to_ptr.vmem [resolvable:$true] %s19_s8  ;;  %s43_s10 = int_to_ptr.vmem [resolvable:$true] %s42_s10 }
  0x15   :  { %s431_s13 = scalar_lea.hbm %s615_s0, 128 }
  0x16   :  { %p432_p8 = scmp.ne.s32.totalorder %s615_s0, %s431_s13  ;;  %p435_p9 = scmp.lt.u32.totalorder %s431_s13, %s615_s0 }
  0x18   :  { %p437_p10 = pnand %p435_p9, %p432_p8 }
  0x1a   :  { %440 = shalt.err (!%p437_p10)
}
  0x1b   :  { %s441_s1 = scalar_lea.vmem %s20_s8, 128  ;;  %p446_p12 = scmp.lt.s32.totalorder %s20_s8, %s20_s8 }
  0x1c   :  { %p442_p11 = scmp.ne.s32.totalorder %s20_s8, %s441_s1  ;;  %p447_p13 = scmp.lt.s32.totalorder %s441_s1, %s441_s1 }
  0x1e   :  { %p448_p0 = por %p447_p13, %p446_p12 }
  0x20   :  { %p449_p1 = pnand %p448_p0, %p442_p11 }
  0x22   :  { %452 = shalt.err (!%p449_p1)
}
  0x23   :  { %22 = dma.hbm_to_vmem [thread:$0]  %s615_s0, 128, %s20_s8, [#allocation3]  }
  0x24   :  { %s453_s22 = scalar_lea.hbm %s618_s3, 2048 }
  0x25   :  { %p454_p2 = scmp.ne.s32.totalorder %s618_s3, %s453_s22  ;;  %p457_p3 = scmp.lt.u32.totalorder %s453_s22, %s618_s3 }
  0x27   :  { %p459_p4 = pnand %p457_p3, %p454_p2 }
  0x29   :  { %462 = shalt.err (!%p459_p4)
}
  0x2a   :  { %s463_s27 = scalar_lea.vmem %s43_s10, 2048  ;;  %p468_p6 = scmp.lt.s32.totalorder %s43_s10, %s43_s10 }
  0x2b   :  { %p464_p5 = scmp.ne.s32.totalorder %s43_s10, %s463_s27  ;;  %p469_p7 = scmp.lt.s32.totalorder %s463_s27, %s463_s27 }
  0x2d   :  { %p470_p8 = por %p469_p7, %p468_p6 }
  0x2f   :  { %p471_p9 = pnand %p470_p8, %p464_p5 }
  0x31   :  { %474 = shalt.err (!%p471_p9)
}
  0x32   :  { %48 = dma.hbm_to_vmem [thread:$0]  %s618_s3, 2048, %s43_s10, [#allocation6], %s504_s28, %s504_s28, %s505_s29  }
  0x33   :  { %497 = dma.done.wait [#allocation3], 128  }
  0x34   :  { %498 = vsyncadd [#allocation3], 4294967168 }
  0x35   :  { %499 = dma.done.wait [#allocation6], 3456  }
  0x36   :  { %500 = vsyncadd [#allocation6], 4294963840  ;;  %v508_v0 = vmov 0.0|0.0   ;;  %vm509_vm0 = vmmov 0   ;;  %v510_v1 = vmov 0.0   ;;  %v61_v2 = vld [vmem:[#allocation5] sm:$0xff] }
  0x37   :  { %361 = vmatprep.subr.bf16.mxu0 %v508_v0  ;;  %323 = vmatprep.mubr.msk.f32.mxu0 %vm509_vm0, %v510_v1  ;;  %v62_v3 = vld [vmem:[#allocation5 + $0x8] sm:$0xff]  ;;  %v63_v4 = vld [vmem:[#allocation5 + $0x10] sm:$0xff]  ;;  %v64_v6 = vld [vmem:[#allocation5 + $0x18] sm:$0xff]  ;;  %vm83_vm1 = vcmask 1043456   ;;  %vm79_vm2 = vcmask 687104   ;;  %s511_s7 = smov [#allocation8]  }
  0x38   :  { %376 = vmatprep.subr.bf16.mxu1 %v508_v0  ;;  %358 = vmatprep.mubr.msk.f32.mxu1 %vm509_vm0, %v510_v1  ;;  %v362_v5 = vpack.c.bf16 %v62_v3, %v61_v2  ;;  %v365_v7 = vpack.c.bf16 %v64_v6, %v63_v4  ;;  %v65_v8 = vld [vmem:[#allocation5 + $0x20] sm:$0xff]  ;;  %v66_v9 = vld [vmem:[#allocation5 + $0x28] sm:$0xff]  ;;  %v158_v10 = vld [vmem:[#allocation7] sm:$0xff]  ;;  %s258_s8 = sshll.u32 %s511_s7, 4  ;;  %s259_s8 = int_to_ptr.vmem [resolvable:$true] %s258_s8 }
  0x39   :  { %v159_v11 = vld [vmem:[#allocation7 + $0x8] sm:$0xff]  ;;  %v160_v12 = vld [vmem:[#allocation7 + $0x10] sm:$0xff]  ;;  %v161_v14 = vld [vmem:[#allocation7 + $0x18] sm:$0xff]  ;;  %v368_v15 = vpack.c.bf16 %v66_v9, %v65_v8  ;;  %s475_s9 = scalar_lea.vmem %s259_s8, 128  ;;  %p480_p11 = scmp.lt.s32.totalorder %s259_s8, %s259_s8 }
  0x3a   :  { %363 = vmatpush3.bf16.msra.mxu0 %v362_v5  ;;  %v377_v13 = vpack.c.bf16 %v159_v11, %v158_v10  ;;  %v67_v16 = vld [vmem:[#allocation5 + $0x30] sm:$0xff]  ;;  %v380_v17 = vpack.c.bf16 %v161_v14, %v160_v12  ;;  %v68_v18 = vld [vmem:[#allocation5 + $0x38] sm:$0xff]  ;;  %v163_v20 = vld [vmem:[#allocation7 + $0x28] sm:$0xff]  ;;  %p476_p10 = scmp.ne.s32.totalorder %s259_s8, %s475_s9  ;;  %p481_p12 = scmp.lt.s32.totalorder %s475_s9, %s475_s9 }
  0x3b   :  { %364 = vmatprep.subr.bf16.mxu0 %v508_v0  ;;  %v162_v19 = vld [vmem:[#allocation7 + $0x20] sm:$0xff]  ;;  %v371_v21 = vpack.c.bf16 %v68_v18, %v67_v16  ;;  %v69_v22 = vld [vmem:[#allocation5 + $0x40] sm:$0xff]  ;;  %v70_v24 = vld [vmem:[#allocation5 + $0x48] sm:$0xff] }
  0x3c   :  { %378 = vmatpush3.bf16.msra.mxu1 %v377_v13  ;;  %v383_v23 = vpack.c.bf16 %v163_v20, %v162_v19  ;;  %v164_v25 = vld [vmem:[#allocation7 + $0x30] sm:$0xff]  ;;  %v165_v26 = vld [vmem:[#allocation7 + $0x38] sm:$0xff]  ;;  %v374_v27 = vpack.c.bf16 %v70_v24, %v69_v22  ;;  %v166_v29 = vld [vmem:[#allocation7 + $0x40] sm:$0xff]  ;;  %p482_p13 = por %p481_p12, %p480_p11 }
  0x3d   :  { %379 = vmatprep.subr.bf16.mxu1 %v508_v0  ;;  %v386_v28 = vpack.c.bf16 %v165_v26, %v164_v25  ;;  %v167_v30 = vld [vmem:[#allocation7 + $0x48] sm:$0xff]  ;;  %v71_v32 = vld [vmem:[#allocation5 + $0x50] sm:$0xf]  ;;  %v168_v33 = vld [vmem:[#allocation7 + $0x50] sm:$0xff] }
  0x3e   :  { %366 = vmatpush3.bf16.msra.mxu0 %v365_v7  ;;  %v389_v31 = vpack.c.bf16 %v167_v30, %v166_v29  ;;  %v169_v34 = vld [vmem:[#allocation7 + $0x58] sm:$0xff]  ;;  %v60_v35 = vld [vmem:[#allocation2] sm:$0xff]  ;;  %v171_v38 = vld [vmem:[#allocation7 + $0x68] sm:$0xff]  ;;  %p483_p0 = pnand %p482_p13, %p476_p10 }
  0x3f   :  { %367 = vmatprep.subr.bf16.mxu0 %v508_v0  ;;  %v392_v36 = vpack.c.bf16 %v169_v34, %v168_v33  ;;  %v170_v37 = vld [vmem:[#allocation7 + $0x60] sm:$0xff]  ;;  %v172_v40 = vld [vmem:[#allocation7 + $0x70] sm:$0xff]  ;;  %v173_v41 = vld [vmem:[#allocation7 + $0x78] sm:$0xff] }
  0x40   :  { %381 = vmatpush3.bf16.msra.mxu1 %v380_v17  ;;  %v395_v39 = vpack.c.bf16 %v171_v38, %v170_v37  ;;  %v398_v42 = vpack.c.bf16 %v173_v41, %v172_v40  ;;  %v268_v43 = vld [vmem:[%s617_s2] ss:$0 sm:$0xff] }
  0x41   :  { %382 = vmatprep.subr.bf16.mxu1 %v508_v0  ;;  %v271_v48 = vld [vmem:[%s619_s4] ss:$0 sm:$0xff] }
  0x42   :  { %369 = vmatpush3.bf16.msra.mxu0 %v368_v15 }
  0x43   :  { %370 = vmatprep.subr.bf16.mxu0 %v508_v0 }
  0x44   :  { %384 = vmatpush3.bf16.msra.mxu1 %v383_v23 }
  0x45   :  { %385 = vmatprep.subr.bf16.mxu1 %v508_v0 }
  0x46   :  { %372 = vmatpush3.bf16.msra.mxu0 %v371_v21 }
  0x47   :  { %373 = vmatprep.subr.bf16.mxu0 %v508_v0 }
  0x48   :  { %387 = vmatpush3.bf16.msra.mxu1 %v386_v28 }
  0x49   :  { %388 = vmatprep.subr.bf16.mxu1 %v508_v0 }
  0x4a   :  { %375 = vmatpush3.bf16.msra.mxu0 %v374_v27 }
  0x4b   :  { %321 = vmatprep.subr.mxu0 %v510_v1 }
  0x4c   :  { %390 = vmatpush3.bf16.msra.mxu1 %v389_v31 }
  0x4d   :  { %391 = vmatprep.subr.bf16.mxu1 %v508_v0 }
  0x4e   :  { %322 = vmatpush3.msk.msra.mxu0 %vm83_vm1, %v71_v32 }
  0x4f   :  { %324 = vmatmul.mubr.msk.f32.vlgmr.msra.gmra.mrb[0].mxu0 %vm79_vm2, %v60_v35 }
  0x50   :  { %393 = vmatpush3.bf16.msra.mxu1 %v392_v36 }
  0x51   :  { %394 = vmatprep.subr.bf16.mxu1 %v508_v0 }
  0x54   :  { %396 = vmatpush3.bf16.msra.mxu1 %v395_v39 }
  0x55   :  { %397 = vmatprep.subr.bf16.mxu1 %v508_v0 }
  0x58   :  { %399 = vmatpush3.bf16.msra.mxu1 %v398_v42 }
 0x122   :  { %v153_v44 = vpop.f32.mrb[0].mxu0 }
 0x123   :  { %v154_v45 = vadd.f32 %v268_v43, %v153_v44  ;;  %v325_v46 = vpop.f32.mrb[1].mxu0 }
 0x125   :  { %v157_v47 = vmax.f32 %v154_v45, 0.0 }
 0x127   :  { %359 = vmatmul.mubr.f32.vlgmr.msra.gmra.mrb[0].mxu1 %v157_v47 }
 0x1fa   :  { %v247_v49 = vpop.f32.mrb[0].mxu1 }
 0x1fb   :  { %v248_v50 = vadd.f32 %v271_v48, %v247_v49  ;;  %v360_v51 = vpop.f32.mrb[1].mxu1 }
 0x1fd   :  { %251 = vst [vmem:[#allocation8] sm:$0xff] %v248_v50 }
 0x1fe   :  { %486 = shalt.err (!%p483_p0)
}
 0x1ff   :  { %s487_s11 = scalar_lea.hbm %s620_s5, 128 }
 0x200   :  { %p488_p1 = scmp.ne.s32.totalorder %s620_s5, %s487_s11  ;;  %p491_p2 = scmp.lt.u32.totalorder %s487_s11, %s620_s5 }
 0x202   :  { %p493_p3 = pnand %p491_p2, %p488_p1 }
 0x204   :  { %496 = shalt.err (!%p493_p3)
}
 0x205   :  { %261 = dma.vmem_to_hbm [thread:$0]  %s259_s8, 128, %s620_s5, [#allocation4]  }
 0x206   :  { %501 = dma.done.wait [#allocation4], 128  }
 0x207   :  { %502 = vsyncadd [#allocation4], 4294967168 }
 0x208   :  { %265 = vsyncpa [#allocation3], 1 }
 0x209   :  { %266 = vsyncpa [#allocation6], 1 }
 0x20a   :  { %267 = vsyncpa [#allocation4], 1 }

</bundles_post_ra>
